<compile_context>
chip_gen: v5e
topology: v5e:2x2
jax: 0.10.0
libtpu: 0.0.40
codegen_flags: <defaults>
</compile_context>

<pallas_src>
import jax
import jax.numpy as jnp
from jax.experimental import pallas as pl
from jax.experimental.pallas import tpu as pltpu


def _forecast_kernel(h_ref, w_ref, b_ref, out_ref):
    # [TB, H] @ [H, T] on the MXU with f32 accumulation, then lane-dense bias add.
    out = jnp.dot(h_ref[...], w_ref[...], preferred_element_type=jnp.float32)
    out_ref[...] = (out + b_ref[...]).astype(out_ref.dtype)


def _round_up(x, m):
    return ((x + m - 1) // m) * m


def _round_down_mult(x, m):
    return max(m, (x // m) * m)


# >= 4 grid steps per TensorCore on v7x megacore so both cores get work and each
# can still prefetch block i+1 while computing block i.
_MIN_GRID_STEPS = 8


def _choose_batch_tile(B, block_rows):
    """Pick a batch tile that is (8,128)-legal and keeps enough grid steps."""
    if B <= block_rows:
        return B  # full-extent block along batch: always legal, single step.
    tb = min(block_rows, _round_up(pl.cdiv(B, _MIN_GRID_STEPS), 8))
    return _round_down_mult(tb, 8)  # TB < B must be a multiple of 8.


def forecast_forward(hidden, weight_t, bias, *, block_rows=4096,
                     cast_to_bf16=False, hidden_buffers=2):
    """hidden: [B, H] f32, weight_t: [H, T] f32, bias: [1, T] f32
       returns (outputs [B, T] f32, tags [B] i32)"""
    B, H = hidden.shape
    T = weight_t.shape[1]
    assert weight_t.shape[0] == H and bias.shape == (1, T)

    if cast_to_bf16:
        # Halves the dominant HBM read traffic. Accumulation / bias / outputs stay
        # f32; outputs no longer bit-match the f32 torch reference at 1e-5.
        hidden = hidden.astype(jnp.bfloat16)
        weight_t = weight_t.astype(jnp.bfloat16)

    TB = _choose_batch_tile(B, block_rows)
    grid = (pl.cdiv(B, TB),)

    hidden_spec_kwargs = {}
    if hidden_buffers > 2:
        # Extra-deep pipelining on the mem-bound hidden stream (sweep knob).
        hidden_spec_kwargs["pipeline_mode"] = pl.Buffered(hidden_buffers)

    h_bytes = hidden.dtype.itemsize
    w_bytes = weight_t.dtype.itemsize

    outputs = pl.pallas_call(
        _forecast_kernel,
        out_shape=jax.ShapeDtypeStruct((B, T), jnp.float32),
        grid=grid,
        in_specs=[
            # Batch-tiled hidden stream (auto double-buffered by the pipeline).
            pl.BlockSpec((TB, H), lambda i: (i, 0), **hidden_spec_kwargs),
            # Weight / bias resident in VMEM across all grid steps.
            pl.BlockSpec((H, T), lambda i: (0, 0)),
            pl.BlockSpec((1, T), lambda i: (0, 0)),
        ],
        out_specs=pl.BlockSpec((TB, T), lambda i: (i, 0)),
        compiler_params=pltpu.CompilerParams(
            # Batch axis is independent -> megacore sharding on v7x (no-op v5e/v6e).
            dimension_semantics=("parallel",),
        ),
        cost_estimate=pl.CostEstimate(
            flops=2 * B * H * T,
            transcendentals=0,
            bytes_accessed=B * H * h_bytes + H * T * w_bytes + T * 4 + B * T * 4,
        ),
    )(hidden, weight_t, bias)

    # Tiny XLA epilogue on the already-materialized [B, T] outputs. Keeping the
    # sigmoid matches the literal torch graph (f32 saturation ties, NaN-as-max
    # argmax behaviour). tags are int32 (torch argmax returns int64).
    tags = jnp.argmax(jax.nn.sigmoid(outputs), axis=1)
    return outputs, tags


class ForecastPallas:
    """Synthetic stand-in for net/forecast.Forecast (no config/meta files):
    tar_num is passed explicitly instead of being read from disk."""

    def __init__(self, task, hidden_size, tar_num, key):
        self.task = task
        # nn.Linear default init: U(-1/sqrt(H), 1/sqrt(H)) for weight and bias.
        kw, kb = jax.random.split(key)
        bound = 1.0 / (hidden_size ** 0.5)
        w = jax.random.uniform(kw, (tar_num, hidden_size), jnp.float32, -bound, bound)
        b = jax.random.uniform(kb, (tar_num,), jnp.float32, -bound, bound)
        self.weight_t = jnp.transpose(w)          # [H, T] pre-transposed for row-major matmul
        self.bias = b.reshape(1, tar_num)         # [1, T] lane-dense broadcast

    def __call__(self, hidden, *, block_rows=4096, cast_to_bf16=False,
                 hidden_buffers=2):
        return forecast_forward(hidden, self.weight_t, self.bias,
                                block_rows=block_rows,
                                cast_to_bf16=cast_to_bf16,
                                hidden_buffers=hidden_buffers)


if __name__ == "__main__":
    key = jax.random.PRNGKey(0)
    k_param, k_hidden = jax.random.split(key)

    batch_size = 64
    hidden_size = 128
    tar_num = 16   # stands in for len(self.accu) read from the meta file
    # TODO(synk): original module reads tar_num from config/meta_* files; fixed here.

    model = ForecastPallas("accu", hidden_size, tar_num, k_param)
    hidden = jax.random.normal(k_hidden, (batch_size, hidden_size), jnp.float32)

    # Reference in plain JAX.
    ref_out = hidden @ model.weight_t + model.bias
    ref_tags = jnp.argmax(jax.nn.sigmoid(ref_out), axis=1)

    # 1) Tiled path: block_rows=16 with B=64 -> TB=8 (multiple of 8), 8 grid steps,
    #    exercising pipelined batch tiling and the min-grid-steps guard.
    outputs, tags = model(hidden, block_rows=16)
    outputs = jax.block_until_ready(outputs)
    tags = jax.block_until_ready(tags)
    assert jnp.allclose(outputs, ref_out, atol=1e-5, rtol=1e-5)
    assert jnp.array_equal(tags, ref_tags)

    # 2) Default large-tile path: B <= block_rows -> single full-extent block.
    outputs2, tags2 = model(hidden)
    jax.block_until_ready(outputs2)
    assert jnp.allclose(outputs2, ref_out, atol=1e-5, rtol=1e-5)
    assert jnp.array_equal(tags2, ref_tags)

    # 3) Optional bandwidth path: bf16 hidden/weight stream (relaxed tolerance,
    #    no longer bit-matches the f32 torch reference).
    outputs3, _ = model(hidden, cast_to_bf16=True)
    jax.block_until_ready(outputs3)
    assert jnp.allclose(outputs3, ref_out, atol=5e-2, rtol=5e-2)

    _ = tags.tolist()  # matches torch .tolist() contract
    print("KERNEL_OK")
</pallas_src>

<mosaic_0001>
module attributes {stable_mosaic.version = 11 : i64} {
  func.func @_forecast_kernel(%arg0: i32, %arg1: memref<8x128xf32, #tpu.memory_space<vmem>>, %arg2: memref<128x16xf32, #tpu.memory_space<vmem>>, %arg3: memref<1x16xf32, #tpu.memory_space<vmem>>, %arg4: memref<8x16xf32, #tpu.memory_space<vmem>>) attributes {dimension_semantics = [#tpu.dimension_semantics<parallel>], iteration_bounds = array<i64: 8>, scalar_prefetch = 0 : i64, scratch_operands = 0 : i64, tpu.core_type = #tpu.core_type<tc>, window_params = [{transform_indices = @transform_0, window_bounds = array<i64: 8, 128>}, {pipeline_mode = #tpu.pipeline_mode<synchronous>, transform_indices = @transform_1, window_bounds = array<i64: 128, 16>}, {pipeline_mode = #tpu.pipeline_mode<synchronous>, transform_indices = @transform_2, window_bounds = array<i64: 1, 16>}, {transform_indices = @transform_3, window_bounds = array<i64: 8, 16>}]} {
    %c0 = arith.constant 0 : index
    %c0_0 = arith.constant 0 : index
    %0 = vector.load %arg1[%c0, %c0_0] : memref<8x128xf32, #tpu.memory_space<vmem>>, vector<8x128xf32>
    %c0_1 = arith.constant 0 : index
    %c0_2 = arith.constant 0 : index
    %1 = vector.load %arg2[%c0_1, %c0_2] : memref<128x16xf32, #tpu.memory_space<vmem>>, vector<128x16xf32>
    %cst = arith.constant dense<0.000000e+00> : vector<8x16xf32>
    %2 = tpu.matmul %0, %1, %cst {dimension_numbers = #tpu.dot_dimension_numbers<[1], [0], [0], [1], [0, 0, 1, 1], [], []>} : vector<8x128xf32>, vector<128x16xf32>, vector<8x16xf32> -> vector<8x16xf32>
    %c0_3 = arith.constant 0 : index
    %c0_4 = arith.constant 0 : index
    %3 = vector.load %arg3[%c0_3, %c0_4] : memref<1x16xf32, #tpu.memory_space<vmem>>, vector<1x16xf32>
    %4 = vector.broadcast %3 : vector<1x16xf32> to vector<8x16xf32>
    %5 = arith.addf %2, %4 : vector<8x16xf32>
    %c0_5 = arith.constant 0 : index
    %c0_6 = arith.constant 0 : index
    %6 = vector.load %arg4[%c0_5, %c0_6] : memref<8x16xf32, #tpu.memory_space<vmem>>, vector<8x16xf32>
    tpu.vector_store %arg4[%c0_5, %c0_6], %5 {strides = array<i32>} : memref<8x16xf32, #tpu.memory_space<vmem>>, vector<8x16xf32>,
    return
  }
  func.func @transform_0(%arg0: i32) -> (i32, i32) {
    %c0_i32 = arith.constant 0 : i32
    %c0_i32_0 = arith.constant 0 : i32
    return %arg0, %c0_i32 : i32, i32
  }
  func.func @transform_1(%arg0: i32) -> (i32, i32) {
    %c0_i32 = arith.constant 0 : i32
    %c0_i32_0 = arith.constant 0 : i32
    %c0_i32_1 = arith.constant 0 : i32
    return %c0_i32, %c0_i32_0 : i32, i32
  }
  func.func @transform_2(%arg0: i32) -> (i32, i32) {
    %c0_i32 = arith.constant 0 : i32
    %c0_i32_0 = arith.constant 0 : i32
    %c0_i32_1 = arith.constant 0 : i32
    return %c0_i32, %c0_i32_0 : i32, i32
  }
  func.func @transform_3(%arg0: i32) -> (i32, i32) {
    %c0_i32 = arith.constant 0 : i32
    %c0_i32_0 = arith.constant 0 : i32
    return %arg0, %c0_i32 : i32, i32
  }
}

</mosaic_0001>

<bundles_post_ra>
// kernel: tpu_custom_call.1
= control target key start
LH: loop header
LB: loop body
LE: loop exit
PB: predicated region body
PF: predicated region fallthrough
CT: control target
= control target key end

     0   :  { %s308_s12 = smov 0   ;;  %s376_s0 = inlined_call_operand.vmem [shape: f32[64,128], index: 0, kind: input, shape index: {}]   ;;  %s377_s1 = inlined_call_operand.vmem [shape: f32[128,16], index: 1, kind: input, shape index: {}]   ;;  %s378_s2 = inlined_call_operand.vmem [shape: f32[1,16], index: 2, kind: input, shape index: {}]   ;;  %s379_s3 = inlined_call_operand.vmem [shape: f32[64,16], index: 3, kind: output, shape index: {}]  }
   0x1 LB: > { %s262_s13 = sadd.s32 4294967295, %s286_s12   ;;  %p266_p0 = scmp.ge.s32.totalorder %s286_s12, 1  ;;  %s286_s12 = sphi %s308_s12, %s13_s12  }
   0x2   : > { %p136_p1 = scmp.lt.s32.totalorder %s286_s12, 9 }
   0x4   : > { %p137_p2 = pnand %p266_p0, %p136_p1 }
   0x5   : > { %p158_p3 = scmp.lt.s32.totalorder (!%p137_p2), %s262_s13, 7 }
   0x6   : > { %140 = sbr.rel (%p137_p2) target bundleno = 172 (0xac), region = 32 }
   0xb   : > { %v182_v0 = vld [vmem:[%s377_s1 + $0x78] sm:$0xff]  ;;  %v181_v1 = vld [vmem:[%s377_s1 + $0x70] sm:$0xff]  ;;  %v180_v2 = vld [vmem:[%s377_s1 + $0x68] sm:$0xff]  ;;  %s381_s13 = smov (!%p158_p3, %s262_s13), 7  ;;  %vm207_vm0 = vcmask 130048  }
   0xc   : > { %187 = vmatpush.msra.mxu0 %v182_v0  ;;  %v179_v3 = vld [vmem:[%s377_s1 + $0x60] sm:$0xff]  ;;  %v178_v4 = vld [vmem:[%s377_s1 + $0x58] sm:$0xff]  ;;  %v177_v5 = vld [vmem:[%s377_s1 + $0x50] sm:$0xff]  ;;  %s267_s15 = sshll.u32 %s381_s13, 3 }
   0xd   : > { %v176_v6 = vld [vmem:[%s377_s1 + $0x48] sm:$0xff]  ;;  %v175_v7 = vld [vmem:[%s377_s1 + $0x40] sm:$0xff]  ;;  %v174_v8 = vld [vmem:[%s377_s1 + $0x38] sm:$0xff]  ;;  %s161_s22 = scalar_lea.vmem %s376_s0, %s267_s15  ;;  %s165_s28 = scalar_lea.vmem %s379_s3, %s267_s15 }
   0xe   : > { %188 = vmatpush.msra.mxu0 %v181_v1  ;;  %v173_v9 = vld [vmem:[%s377_s1 + $0x30] sm:$0xff]  ;;  %v172_v10 = vld [vmem:[%s377_s1 + $0x28] sm:$0xff]  ;;  %v171_v11 = vld [vmem:[%s377_s1 + $0x20] sm:$0xff] }
   0xf   : > { %v170_v12 = vld [vmem:[%s377_s1 + $0x18] sm:$0xff]  ;;  %v169_v13 = vld [vmem:[%s377_s1 + $0x10] sm:$0xff]  ;;  %v168_v14 = vld [vmem:[%s377_s1 + $0x8] sm:$0xff] }
  0x10   : > { %189 = vmatpush.msra.mxu0 %v180_v2  ;;  %v167_v15 = vld [vmem:[%s377_s1] sm:$0xff] }
  0x11   : > { %v166_v16 = vld [vmem:[%s161_s22] sm:$0xff] }
  0x12   : > { %190 = vmatpush.msra.mxu0 %v179_v3  ;;  %v279_v17 = vld [vmem:[%s378_s2] ss:$0 sm:$0xff] }
  0x14   : > { %191 = vmatpush.msra.mxu0 %v178_v4 }
  0x16   : > { %192 = vmatpush.msra.mxu0 %v177_v5 }
  0x18   : > { %193 = vmatpush.msra.mxu0 %v176_v6 }
  0x1a   : > { %194 = vmatpush.msra.mxu0 %v175_v7 }
  0x1c   : > { %195 = vmatpush.msra.mxu0 %v174_v8 }
  0x1e   : > { %196 = vmatpush.msra.mxu0 %v173_v9 }
  0x20   : > { %197 = vmatpush.msra.mxu0 %v172_v10 }
  0x22   : > { %198 = vmatpush.msra.mxu0 %v171_v11 }
  0x24   : > { %199 = vmatpush.msra.mxu0 %v170_v12 }
  0x26   : > { %200 = vmatpush.msra.mxu0 %v169_v13 }
  0x28   : > { %201 = vmatpush.msra.mxu0 %v168_v14 }
  0x2a   : > { %202 = vmatpush.msra.mxu0 %v167_v15 }
  0x2b   : > { %203 = vmatmul.f32.vlgmr.msra.gmra.mxu0 %v166_v16 }
  0xa8   : > { %v204_v18 = vpop.f32.mrf.mxu0 }
  0xa9   : > { %v205_v19 = vadd.f32 %v279_v17, %v204_v18 }
  0xab   : > { %208 = vst.msk [vmem:[%s165_s28] sm:$0xff] %vm207_vm0, %v205_v19 }
  0xac PF: > { %s13_s12 = sadd.s32 1, %s286_s12  }
  0xad   : > { %p10_p4 = scmp.ge.s32.totalorder %s13_s12, 10  }
  0xaf   :  { %12 = sbr.rel (!%p10_p4) target bundleno = 1 (0x1), region = 62 }

</bundles_post_ra>
